<compile_context>
chip_gen: v7x
topology: tpu7x:2x2x1
jax: 0.10.0
libtpu: 0.0.40
codegen_flags: <defaults>
</compile_context>

<pallas_src>
import jax
import jax.numpy as jnp
from jax.experimental import pallas as pl
from jax.experimental.pallas import tpu as pltpu


def _exp_rbf_kernel(x_ref, o_ref):
    x = x_ref[...]
    o_ref[...] = jnp.exp(-(x * x)).astype(o_ref.dtype)


def exp_rbf(x: jax.Array, *, target_block_bytes: int = 2 * 1024 * 1024) -> jax.Array:
    """Computes exp(-x**2) elementwise, matching torch.exp(-x ** 2)."""
    orig_shape = x.shape
    dtype = x.dtype
    n = x.size
    if n == 0:
        return x

    itemsize = jnp.dtype(dtype).itemsize
    # Minimum sublane count of the native (sublane, 128) tile for this dtype:
    # 8 for 4-byte, 16 for 2-byte, 32 for 1-byte types.
    min_sublanes = max(8, 32 // max(itemsize, 1))
    lanes = 128

    x_flat = jnp.ravel(x)
    padded = (n % lanes) != 0
    if padded:
        # Ragged flat length: pad only up to the next multiple of 128.
        n_pad = ((n + lanes - 1) // lanes) * lanes
        x_flat = jnp.pad(x_flat, (0, n_pad - n))
    else:
        n_pad = n

    # Widest lane-dense last dim (multiple of 128) that divides the flat length.
    width = lanes
    for cand in (2048, 1024, 512, 256):
        if n_pad % cand == 0:
            width = cand
            break
    rows = n_pad // width
    x2d = x_flat.reshape(rows, width)

    # Block rows: aim for ~target_block_bytes per block, multiple of min_sublanes.
    tr = target_block_bytes // (width * itemsize)
    tr = max(min_sublanes, (tr // min_sublanes) * min_sublanes)
    if tr >= rows:
        # Whole row dim in one block (block dim == full array dim is always legal).
        tr = rows
        grid = (1,)
    else:
        # Pallas masks the partial last block; no shrink loop, no extra padding.
        grid = (pl.cdiv(rows, tr),)

    out2d = pl.pallas_call(
        _exp_rbf_kernel,
        out_shape=jax.ShapeDtypeStruct((rows, width), dtype),
        grid_spec=pltpu.PrefetchScalarGridSpec(
            num_scalar_prefetch=0,
            grid=grid,
            in_specs=[pl.BlockSpec((tr, width), lambda i: (i, 0))],
            out_specs=pl.BlockSpec((tr, width), lambda i: (i, 0)),
        ),
        compiler_params=pltpu.CompilerParams(
            dimension_semantics=("parallel",),
        ),
    )(x2d)

    out_flat = out2d.reshape(-1)
    if padded:
        out_flat = out_flat[:n]
    return out_flat.reshape(orig_shape)


if __name__ == "__main__":
    key = jax.random.PRNGKey(0)
    # Small NCHW-like input consistent with typical usage of the activation.
    x = jax.random.normal(key, (2, 4, 16, 16), dtype=jnp.float32)

    out = exp_rbf(x)
    out = jax.block_until_ready(out)

    # Reference check in plain JAX.
    ref = jnp.exp(-(x ** 2))
    assert out.shape == x.shape and out.dtype == x.dtype
    assert jnp.allclose(out, ref, atol=1e-6, rtol=1e-6)

    # Also exercise a ragged (non-128-aligned) size to cover the fallback path.
    y = jax.random.normal(jax.random.PRNGKey(1), (3, 5, 7), dtype=jnp.float32)
    out_y = jax.block_until_ready(exp_rbf(y))
    assert jnp.allclose(out_y, jnp.exp(-(y ** 2)), atol=1e-6, rtol=1e-6)

    print("KERNEL_OK")
</pallas_src>

<mosaic_0001>
module attributes {stable_mosaic.version = 11 : i64} {
  func.func @_exp_rbf_kernel(%arg0: i32, %arg1: memref<1x2048xf32, #tpu.memory_space<vmem>>, %arg2: memref<1x2048xf32, #tpu.memory_space<vmem>>) attributes {dimension_semantics = [#tpu.dimension_semantics<parallel>], iteration_bounds = array<i64: 1>, scalar_prefetch = 0 : i64, scratch_operands = 0 : i64, tpu.core_type = #tpu.core_type<tc>, window_params = [{transform_indices = @transform_0, window_bounds = array<i64: 1, 2048>}, {transform_indices = @transform_1, window_bounds = array<i64: 1, 2048>}]} {
    %c0 = arith.constant 0 : index
    %c0_0 = arith.constant 0 : index
    %0 = vector.load %arg1[%c0, %c0_0] : memref<1x2048xf32, #tpu.memory_space<vmem>>, vector<1x2048xf32>
    %1 = arith.mulf %0, %0 : vector<1x2048xf32>
    %cst = arith.constant 0.000000e+00 : f32
    %2 = vector.broadcast %cst : f32 to vector<1x2048xf32>
    %3 = arith.subf %2, %1 : vector<1x2048xf32>
    %4 = math.exp %3 : vector<1x2048xf32>
    %c0_1 = arith.constant 0 : index
    %c0_2 = arith.constant 0 : index
    %5 = vector.load %arg2[%c0_1, %c0_2] : memref<1x2048xf32, #tpu.memory_space<vmem>>, vector<1x2048xf32>
    tpu.vector_store %arg2[%c0_1, %c0_2], %4 {strides = array<i32>} : memref<1x2048xf32, #tpu.memory_space<vmem>>, vector<1x2048xf32>,
    return
  }
  func.func @transform_0(%arg0: i32) -> (i32, i32) {
    %c0_i32 = arith.constant 0 : i32
    %c0_i32_0 = arith.constant 0 : i32
    return %arg0, %c0_i32 : i32, i32
  }
  func.func @transform_1(%arg0: i32) -> (i32, i32) {
    %c0_i32 = arith.constant 0 : i32
    %c0_i32_0 = arith.constant 0 : i32
    return %arg0, %c0_i32 : i32, i32
  }
}

</mosaic_0001>

<bundles_post_ra>
// kernel: tpu_custom_call.1
= control target key start
LH: loop header
LB: loop body
LE: loop exit
PB: predicated region body
PF: predicated region fallthrough
CT: control target
= control target key end

     0   :  { %6 = vsyncpa [#allocation3], 0  ;;  %s138_s0 = inlined_call_operand.hbm [shape: f32[1,2048], index: 0, kind: input, shape index: {}]   ;;  %s139_s1 = inlined_call_operand.hbm [shape: f32[1,2048], index: 1, kind: output, shape index: {}]  }
   0x1   :  { %7 = vsyncpa [#allocation4], 0  ;;  %s102_s6 = smov [#allocation2]   ;;  %s54_s10 = scalar_lea.hbm %s138_s0, 256 }
   0x2   :  { %s14_s7 = sshll.u32 %s102_s6, 4  ;;  %p55_p0 = scmp.ne.s32.totalorder %s138_s0, %s54_s10  ;;  %s15_s7 = int_to_ptr.vmem [resolvable:$true] %s14_s7 }
   0x3   :  { %p58_p1 = scmp.lt.u32.totalorder %s54_s10, %s138_s0 }
   0x5   :  { %p60_p2 = pnand %p58_p1, %p55_p0 }
   0x7   :  { %63 = shalt.err (!%p60_p2)
}
   0x8   :  { %s64_s15 = scalar_lea.vmem %s15_s7, 256  ;;  %p69_p4 = scmp.lt.s32.totalorder %s15_s7, %s15_s7 }
   0x9   :  { %p65_p3 = scmp.ne.s32.totalorder %s15_s7, %s64_s15  ;;  %p70_p5 = scmp.lt.s32.totalorder %s64_s15, %s64_s15 }
   0xb   :  { %p71_p6 = por %p70_p5, %p69_p4 }
   0xd   :  { %p72_p7 = pnand %p71_p6, %p65_p3 }
   0xf   :  { %75 = shalt.err (!%p72_p7)
}
  0x10   :  { %17 = dma.hbm_to_vmem [thread:$0]  %s138_s0, 256, %s15_s7, [#allocation3]  }
  0x11   :  { %98 = dma.done.wait [#allocation3], 256  }
  0x12   :  { %99 = vsyncadd [#allocation3], 4294967040  ;;  %v21_v0 = vld [vmem:[#allocation2] sm:$0xff]  ;;  %v22_v1 = vld [vmem:[#allocation2 + $0x8] sm:$0xff]  ;;  %s103_s18 = smov [#allocation5]  }
  0x13   :  { %v23_v2 = vmul.f32 %v21_v0, %v21_v0  ;;  %v24_v3 = vmul.f32 %v22_v1, %v22_v1  ;;  %s39_s19 = sshll.u32 %s103_s18, 4  ;;  %s40_s19 = int_to_ptr.vmem [resolvable:$true] %s39_s19 }
  0x14   :  { %s76_s0 = scalar_lea.vmem %s40_s19, 256  ;;  %p81_p9 = scmp.lt.s32.totalorder %s40_s19, %s40_s19 }
  0x15   :  { %v25_v4 = vsub.f32 0.0, %v23_v2  ;;  %v26_v5 = vsub.f32 0.0, %v24_v3  ;;  %p77_p8 = scmp.ne.s32.totalorder %s40_s19, %s76_s0  ;;  %p82_p10 = scmp.lt.s32.totalorder %s76_s0, %s76_s0 }
  0x17   :  { %v27_v6 = vmul.f32 1.442695, %v25_v4  ;;  %v29_v7 = vmul.f32 1.442695, %v26_v5  ;;  %p83_p11 = por %p82_p10, %p81_p9 }
  0x19   :  { %50 = vpow2.f32 %v27_v6  ;;  %p84_p12 = pnand %p83_p11, %p77_p8 }
  0x1a   :  { %52 = vpow2.f32 %v29_v7 }
  0x23   :  { %v51_v8 = vpop.eup %50 }
  0x24   :  { %v53_v9 = vpop.eup %52  ;;  %31 = vst [vmem:[#allocation5] sm:$0xff] %v51_v8 }
  0x25   :  { %32 = vst [vmem:[#allocation5 + $0x8] sm:$0xff] %v53_v9 }
  0x26   :  { %87 = shalt.err (!%p84_p12)
}
  0x27   :  { %s88_s22 = scalar_lea.hbm %s139_s1, 256 }
  0x28   :  { %p89_p13 = scmp.ne.s32.totalorder %s139_s1, %s88_s22  ;;  %p92_p0 = scmp.lt.u32.totalorder %s88_s22, %s139_s1 }
  0x2a   :  { %p94_p1 = pnand %p92_p0, %p89_p13 }
  0x2c   :  { %97 = shalt.err (!%p94_p1)
}
  0x2d   :  { %42 = dma.vmem_to_hbm [thread:$0]  %s40_s19, 256, %s139_s1, [#allocation4]  }
  0x2e   :  { %100 = dma.done.wait [#allocation4], 256  }
  0x2f   :  { %101 = vsyncadd [#allocation4], 4294967040 }
  0x30   :  { %46 = vsyncpa [#allocation3], 1 }
  0x31   :  { %47 = vsyncpa [#allocation4], 1 }

</bundles_post_ra>
